<compile_context>
chip_gen: v6e
topology: v6e:2x2x1
jax: 0.10.0
libtpu: 0.0.40
codegen_flags: <defaults>
</compile_context>

<pallas_src>
import functools

import jax
import jax.numpy as jnp
from jax import lax
from jax.experimental import pallas as pl
from jax.experimental.pallas import tpu as pltpu


MM_DTYPE = jnp.bfloat16          # MXU operand / inter-kernel activation dtype
_GELU_C = 0.7978845608028654     # sqrt(2/pi)


# --------------------------------------------------------------------------
# Generation-aware tuning helpers
# --------------------------------------------------------------------------
def _vmem_limit_bytes():
    try:
        kind = jax.devices()[0].device_kind.lower()
    except Exception:
        kind = ""
    if any(tag in kind for tag in ("v5 lite", "v5e", "v5p", "v6")):
        return 96 * 1024 * 1024      # 128 MiB physical on v5e/v6e
    if "v7" in kind:
        return 48 * 1024 * 1024      # 64 MiB physical per TensorCore on v7x
    return 32 * 1024 * 1024          # conservative default elsewhere


def _compiler_params(dim_sems):
    return pltpu.CompilerParams(dimension_semantics=dim_sems,
                                vmem_limit_bytes=_vmem_limit_bytes())


def _pick_seq_tile(n, max_tile):
    """Largest multiple-of-8 divisor of n that is <= max_tile, else n."""
    if n <= max_tile:
        return n
    start = max_tile - (max_tile % 8)
    for cand in range(start, 7, -8):
        if n % cand == 0:
            return cand
    # TODO(synk): pl.cdiv grid + masked tail tile for awkward N instead of a
    # whole-sequence block fallback.
    return n


def _pick_row_tile(h, w, max_positions):
    """Largest divisor of h with rows * w <= max_positions (always >= 1)."""
    best = 1
    for cand in range(1, h + 1):
        if h % cand == 0 and cand * w <= max_positions:
            best = cand
    return best


def _head_matrix(inner, heads, dim_head, dtype=jnp.float32):
    """(inner, heads) 0/1 matrix: S[c, h] = 1 iff channel c belongs to head h."""
    c = lax.broadcasted_iota(jnp.int32, (inner, heads), 0) // dim_head
    hh = lax.broadcasted_iota(jnp.int32, (inner, heads), 1)
    return (c == hh).astype(dtype)


# --------------------------------------------------------------------------
# Kernel 1: fused 1x1 projections -> four lane-dense outputs
# --------------------------------------------------------------------------
def _proj_kernel(x_ref, wlq_ref, wq_ref, wk_ref, wv_ref,
                 lq_ref, q_ref, k_ref, v_ref):
    x = x_ref[0]                                           # (tn, Cin) bf16
    for w_r, o_r in ((wlq_ref, lq_ref), (wq_ref, q_ref),
                     (wk_ref, k_ref), (wv_ref, v_ref)):
        y = jnp.dot(x, w_r[...], preferred_element_type=jnp.float32)
        o_r[0] = y.astype(o_r.dtype)


def fused_projections(xf, w_lin_q, w_q, w_k, w_v, *, seq_tile):
    B, N, C = xf.shape
    inner = w_q.shape[1]
    tn = _pick_seq_tile(N, seq_tile)
    grid = (B, N // tn)
    x_spec = pl.BlockSpec((1, tn, C), lambda b, t: (b, t, 0))
    w_spec = pl.BlockSpec((C, inner), lambda b, t: (0, 0))
    o_spec = pl.BlockSpec((1, tn, inner), lambda b, t: (b, t, 0))
    out_sds = jax.ShapeDtypeStruct((B, N, inner), MM_DTYPE)
    return pl.pallas_call(
        _proj_kernel,
        out_shape=(out_sds,) * 4,
        grid=grid,
        in_specs=[x_spec, w_spec, w_spec, w_spec, w_spec],
        out_specs=(o_spec,) * 4,
        compiler_params=_compiler_params(("parallel", "parallel")),
    )(xf, w_lin_q, w_q, w_k, w_v)


# --------------------------------------------------------------------------
# Kernel 2: DepthWiseConv2d (3x3 dw + 1x1 pw) as a halo-tiled matmul kernel
# --------------------------------------------------------------------------
def _dwpw_kernel(xp_ref, wk_ref, wv_ref, ok_ref, ov_ref, xbuf, sem, *,
                 th, width, cin):
    bi = pl.program_id(0)
    rt = pl.program_id(1)
    r0 = pl.multiple_of(rt * th, th)
    cp = pltpu.make_async_copy(xp_ref.at[bi, pl.ds(r0, th + 2)], xbuf, sem)
    cp.start()
    cp.wait()

    n = th * width
    inner = wk_ref.shape[2]
    acc_k = jnp.zeros((n, inner), jnp.float32)
    acc_v = jnp.zeros((n, inner), jnp.float32)
    j = 0
    for di in range(3):
        for dj in range(3):
            tap = xbuf[di:di + th, dj:dj + width, :].reshape(n, cin)
            acc_k += jnp.dot(tap, wk_ref[j], preferred_element_type=jnp.float32)
            acc_v += jnp.dot(tap, wv_ref[j], preferred_element_type=jnp.float32)
            j += 1
    ok_ref[0] = acc_k.reshape(th, width, inner).astype(ok_ref.dtype)
    ov_ref[0] = acc_v.reshape(th, width, inner).astype(ov_ref.dtype)


def depthwise_pointwise_conv(x_hw, wk_comb, wv_comb, *, row_tile):
    """x_hw: (B, H, W, C) bf16; w*_comb: (9, C, inner) combined dw*pw weights."""
    B, H, W, C = x_hw.shape
    inner = wk_comb.shape[2]
    th = _pick_row_tile(H, W, row_tile)
    xp = jnp.pad(x_hw, ((0, 0), (1, 1), (1, 1), (0, 0)))
    grid = (B, H // th)
    w_spec = pl.BlockSpec((9, C, inner), lambda b, r: (0, 0, 0))
    o_spec = pl.BlockSpec((1, th, W, inner), lambda b, r: (b, r, 0, 0))
    out_sds = jax.ShapeDtypeStruct((B, H, W, inner), MM_DTYPE)
    kern = functools.partial(_dwpw_kernel, th=th, width=W, cin=C)
    return pl.pallas_call(
        kern,
        out_shape=(out_sds, out_sds),
        grid=grid,
        in_specs=[pl.BlockSpec(memory_space=pl.ANY), w_spec, w_spec],
        out_specs=(o_spec, o_spec),
        scratch_shapes=[pltpu.VMEM((th + 2, W + 2, C), x_hw.dtype),
                        pltpu.SemaphoreType.DMA(())],
        compiler_params=_compiler_params(("parallel", "parallel")),
    )(xp, wk_comb, wv_comb)


# --------------------------------------------------------------------------
# Kernel 3: linear attention context (flash-style reduction over N)
# --------------------------------------------------------------------------
def _lin_context_kernel(k_ref, v_ref, ctx_ref, m_sc, s_sc, c_sc, *,
                        heads, dim_head):
    inner = heads * dim_head
    t = pl.program_id(1)

    @pl.when(t == 0)
    def _():
        m_sc[...] = jnp.full(m_sc.shape, -jnp.inf, m_sc.dtype)
        s_sc[...] = jnp.zeros(s_sc.shape, s_sc.dtype)
        c_sc[...] = jnp.zeros(c_sc.shape, c_sc.dtype)

    k = k_ref[0].astype(jnp.float32)                       # (tn, inner)
    v = v_ref[0]                                           # (tn, inner) bf16

    # online softmax over the N (sequence) axis, per k feature column
    m_old = m_sc[...]                                      # (1, inner)
    m_new = jnp.maximum(m_old, jnp.max(k, axis=0, keepdims=True))
    alpha = jnp.exp(m_old - m_new)                         # (1, inner)
    p = jnp.exp(k - m_new)                                 # (tn, inner)
    s_sc[...] = alpha * s_sc[...] + jnp.sum(p, axis=0, keepdims=True)

    # transposed context accumulator  c_sc[e, d] += sum_n v[n, e] * p[n, d]
    # (transposed so alpha / 1/s are lane broadcasts over the d axis)
    contrib = lax.dot_general(v, p.astype(v.dtype),
                              (((0,), (0,)), ((), ())),
                              preferred_element_type=jnp.float32)
    c_sc[...] = alpha * c_sc[...] + contrib
    m_sc[...] = m_new

    @pl.when(t == pl.num_programs(1) - 1)
    def _():
        inv_s = 1.0 / s_sc[...]                            # exact: sums over N
        d_i = lax.broadcasted_iota(jnp.int32, (inner, inner), 0) // dim_head
        e_i = lax.broadcasted_iota(jnp.int32, (inner, inner), 1) // dim_head
        mask = (d_i == e_i).astype(jnp.float32)            # block-diag per head
        ct = c_sc[...] * inv_s * mask                      # still (e, d)
        ctx_ref[0] = jnp.transpose(ct).astype(ctx_ref.dtype)   # (d, e)


def linear_context(lin_k, lin_v, *, heads, dim_head, seq_tile):
    B, N, inner = lin_k.shape
    tn = _pick_seq_tile(N, seq_tile)
    grid = (B, N // tn)
    in_spec = pl.BlockSpec((1, tn, inner), lambda b, t: (b, t, 0))
    out_spec = pl.BlockSpec((1, inner, inner), lambda b, t: (b, 0, 0))
    kern = functools.partial(_lin_context_kernel, heads=heads, dim_head=dim_head)
    return pl.pallas_call(
        kern,
        out_shape=jax.ShapeDtypeStruct((B, inner, inner), MM_DTYPE),
        grid=grid,
        in_specs=[in_spec, in_spec],
        out_specs=out_spec,
        scratch_shapes=[pltpu.VMEM((1, inner), jnp.float32),
                        pltpu.VMEM((1, inner), jnp.float32),
                        pltpu.VMEM((inner, inner), jnp.float32)],
        compiler_params=_compiler_params(("parallel", "arbitrary")),
    )(lin_k, lin_v)


# --------------------------------------------------------------------------
# Kernel 4: linear attention output (per-head q softmax + dense context matmul)
# --------------------------------------------------------------------------
def _lin_out_kernel(q_ref, ctx_ref, o_ref, *, heads, dim_head, scale):
    inner = heads * dim_head
    q = q_ref[0].astype(jnp.float32)                       # (tn, inner)
    # row-global max is constant within each head's group -> per-head softmax
    # is unchanged (shift invariance), and it keeps everything lane-dense.
    m = jnp.max(q, axis=-1, keepdims=True)
    e = jnp.exp(q - m)                                     # (tn, inner)
    S = _head_matrix(inner, heads, dim_head)               # (inner, heads)
    s = lax.dot_general(e, S, (((1,), (0,)), ((), ())),
                        preferred_element_type=jnp.float32)        # (tn, h)
    r = pl.reciprocal(s, approx=True)
    r_full = lax.dot_general(r, S, (((1,), (1,)), ((), ())),
                             preferred_element_type=jnp.float32)   # (tn, inner)
    qn = (e * r_full * scale).astype(ctx_ref.dtype)
    out = jnp.dot(qn, ctx_ref[0], preferred_element_type=jnp.float32)
    o_ref[0] = out.astype(o_ref.dtype)


def linear_attention_out(lin_q, context, *, heads, dim_head, scale, seq_tile):
    B, N, inner = lin_q.shape
    tn = _pick_seq_tile(N, seq_tile)
    grid = (B, N // tn)
    q_spec = pl.BlockSpec((1, tn, inner), lambda b, t: (b, t, 0))
    c_spec = pl.BlockSpec((1, inner, inner), lambda b, t: (b, 0, 0))
    kern = functools.partial(_lin_out_kernel, heads=heads, dim_head=dim_head,
                             scale=scale)
    return pl.pallas_call(
        kern,
        out_shape=jax.ShapeDtypeStruct((B, N, inner), MM_DTYPE),
        grid=grid,
        in_specs=[q_spec, c_spec],
        out_specs=q_spec,
        compiler_params=_compiler_params(("parallel", "parallel")),
    )(lin_q, context)


# --------------------------------------------------------------------------
# Kernel 5: local 3x3 attention, halo-tiled, heads merged on the lane axis
# --------------------------------------------------------------------------
def _local_attn_kernel(q_ref, kp_ref, vp_ref, o_ref, kbuf, vbuf, sems, *,
                       th, width, heads, dim_head, scale):
    inner = heads * dim_head
    bi = pl.program_id(0)
    rt = pl.program_id(1)
    r0 = pl.multiple_of(rt * th, th)
    cpk = pltpu.make_async_copy(kp_ref.at[bi, pl.ds(r0, th + 2)], kbuf, sems.at[0])
    cpv = pltpu.make_async_copy(vp_ref.at[bi, pl.ds(r0, th + 2)], vbuf, sems.at[1])
    cpk.start()
    cpv.start()
    cpk.wait()
    cpv.wait()

    n = th * width
    q = q_ref[0].reshape(n, inner).astype(jnp.float32) * scale
    S = _head_matrix(inner, heads, dim_head)               # (inner, heads)

    taps = [(di, dj) for di in range(3) for dj in range(3)]
    sims = []
    for di, dj in taps:
        k_j = kbuf[di:di + th, dj:dj + width, :].reshape(n, inner)
        k_j = k_j.astype(jnp.float32)
        sims.append(lax.dot_general(q * k_j, S, (((1,), (0,)), ((), ())),
                                    preferred_element_type=jnp.float32))  # (n, h)

    m = sims[0]
    for s_j in sims[1:]:
        m = jnp.maximum(m, s_j)
    es = [jnp.exp(s_j - m) for s_j in sims]
    den = es[0]
    for e_j in es[1:]:
        den = den + e_j
    r = pl.reciprocal(den, approx=True)                    # (n, h)

    out = jnp.zeros((n, inner), jnp.float32)
    for (di, dj), e_j in zip(taps, es):
        w_full = lax.dot_general(e_j * r, S, (((1,), (1,)), ((), ())),
                                 preferred_element_type=jnp.float32)      # (n, inner)
        v_j = vbuf[di:di + th, dj:dj + width, :].reshape(n, inner)
        out = out + w_full * v_j.astype(jnp.float32)
    o_ref[0] = out.reshape(th, width, inner).astype(o_ref.dtype)


def local_attention(q_map, k_map, v_map, *, heads, dim_head, scale, row_tile):
    """q_map/k_map/v_map: (B, H, W, inner) bf16 -> (B, H, W, inner)."""
    B, H, W, inner = q_map.shape
    th = _pick_row_tile(H, W, row_tile)
    kp = jnp.pad(k_map, ((0, 0), (1, 1), (1, 1), (0, 0)))
    vp = jnp.pad(v_map, ((0, 0), (1, 1), (1, 1), (0, 0)))
    grid = (B, H // th)
    q_spec = pl.BlockSpec((1, th, W, inner), lambda b, r: (b, r, 0, 0))
    kern = functools.partial(_local_attn_kernel, th=th, width=W, heads=heads,
                             dim_head=dim_head, scale=scale)
    return pl.pallas_call(
        kern,
        out_shape=jax.ShapeDtypeStruct((B, H, W, inner), MM_DTYPE),
        grid=grid,
        in_specs=[q_spec,
                  pl.BlockSpec(memory_space=pl.ANY),
                  pl.BlockSpec(memory_space=pl.ANY)],
        out_specs=q_spec,
        scratch_shapes=[pltpu.VMEM((th + 2, W + 2, inner), k_map.dtype),
                        pltpu.VMEM((th + 2, W + 2, inner), v_map.dtype),
                        pltpu.SemaphoreType.DMA((2,))],
        compiler_params=_compiler_params(("parallel", "parallel")),
    )(q_map, kp, vp)


# --------------------------------------------------------------------------
# Kernel 6: output projection with fused GELU + concat
# --------------------------------------------------------------------------
def _out_proj_kernel(lin_ref, full_ref, wl_ref, wf_ref, b_ref, o_ref):
    # TODO(synk): switch to exact erf GELU if Mosaic erf lowering is verified;
    # tanh approximation (EUP) is used in-kernel, fp32 exact erf in reference.
    g = lin_ref[0].astype(jnp.float32)
    g = 0.5 * g * (1.0 + jnp.tanh(_GELU_C * (g + 0.044715 * (g * g * g))))
    y = jnp.dot(g.astype(wl_ref.dtype), wl_ref[...],
                preferred_element_type=jnp.float32)
    y = y + jnp.dot(full_ref[0], wf_ref[...],
                    preferred_element_type=jnp.float32)
    y = y + b_ref[...].astype(jnp.float32)
    o_ref[0] = y.astype(o_ref.dtype)


def output_projection(lin_out, full_out, w_lin, w_full, bias, *, seq_tile,
                      out_dtype=jnp.float32):
    B, N, inner = lin_out.shape
    dim = w_lin.shape[1]
    tn = _pick_seq_tile(N, seq_tile)
    grid = (B, N // tn)
    act_spec = pl.BlockSpec((1, tn, inner), lambda b, t: (b, t, 0))
    w_spec = pl.BlockSpec((inner, dim), lambda b, t: (0, 0))
    b_spec = pl.BlockSpec((1, dim), lambda b, t: (0, 0))
    return pl.pallas_call(
        _out_proj_kernel,
        out_shape=jax.ShapeDtypeStruct((B, N, dim), out_dtype),
        grid=grid,
        in_specs=[act_spec, act_spec, w_spec, w_spec, b_spec],
        out_specs=pl.BlockSpec((1, tn, dim), lambda b, t: (b, t, 0)),
        compiler_params=_compiler_params(("parallel", "parallel")),
    )(lin_out, full_out, w_lin, w_full,
      bias.reshape(1, dim).astype(jnp.float32))


# --------------------------------------------------------------------------
# Full module forward
# --------------------------------------------------------------------------
def linear_attention_forward(fmap_nchw, params, *, heads, dim_head,
                             seq_tile=1024, row_tile=2048):
    scale = dim_head ** (-0.5)
    B, C, H, W = fmap_nchw.shape
    N = H * W
    inner = heads * dim_head

    x = jnp.transpose(fmap_nchw, (0, 2, 3, 1)).astype(MM_DTYPE)   # (B, H, W, C)
    xf = x.reshape(B, N, C)

    # ---- fused 1x1 projections -> four lane-dense outputs ------------------
    w_lin_q = params["w_lin_q"].astype(MM_DTYPE)
    w_q = params["w_q"].astype(MM_DTYPE)
    w_k = params["w_kv"][:, :inner].astype(MM_DTYPE)
    w_v = params["w_kv"][:, inner:].astype(MM_DTYPE)
    lin_q, q_map, k_map, v_map = fused_projections(
        xf, w_lin_q, w_q, w_k, w_v, seq_tile=seq_tile)            # (B, N, inner)

    # ---- DepthWiseConv2d (3x3 dw + 1x1 pw), combined per-tap weights -------
    w_comb = (params["w_dw"][:, :, None] *
              params["w_lin_kv_pw"][None, :, :])                  # (9, C, 2*inner)
    wk_comb = w_comb[..., :inner].astype(MM_DTYPE)
    wv_comb = w_comb[..., inner:].astype(MM_DTYPE)
    lin_k, lin_v = depthwise_pointwise_conv(x, wk_comb, wv_comb,
                                            row_tile=row_tile)
    lin_k = lin_k.reshape(B, N, inner)
    lin_v = lin_v.reshape(B, N, inner)

    # ---- linear-attention branch (flash-style N reduction + dense matmul) --
    context = linear_context(lin_k, lin_v, heads=heads, dim_head=dim_head,
                             seq_tile=seq_tile)                   # (B, inner, inner)
    lin_out = linear_attention_out(lin_q, context, heads=heads,
                                   dim_head=dim_head, scale=scale,
                                   seq_tile=seq_tile)             # (B, N, inner)

    # ---- local 3x3 attention (halo-tiled, heads merged on lanes) -----------
    full_out = local_attention(q_map.reshape(B, H, W, inner),
                               k_map.reshape(B, H, W, inner),
                               v_map.reshape(B, H, W, inner),
                               heads=heads, dim_head=dim_head, scale=scale,
                               row_tile=row_tile)
    full_out = full_out.reshape(B, N, inner)

    # ---- GELU + concat fused into the output projection --------------------
    w_out_lin = params["w_out"][:inner].astype(MM_DTYPE)
    w_out_full = params["w_out"][inner:].astype(MM_DTYPE)
    out = output_projection(lin_out, full_out, w_out_lin, w_out_full,
                            params["b_out"], seq_tile=seq_tile,
                            out_dtype=jnp.float32)                # (B, N, dim)
    dim_out = params["w_out"].shape[1]
    return jnp.transpose(out.reshape(B, H, W, dim_out), (0, 3, 1, 2))   # NCHW


# --------------------------------------------------------------------------
# Pure-JAX reference (same math, fp32 highest precision)
# --------------------------------------------------------------------------
def im2col3x3(x):
    """x: (B, H, W, C) -> (B, H*W, 9, C); 3x3 patches, zero padding."""
    B, H, W, C = x.shape
    xp = jnp.pad(x, ((0, 0), (1, 1), (1, 1), (0, 0)))
    cols = []
    for di in range(3):
        for dj in range(3):
            cols.append(xp[:, di:di + H, dj:dj + W, :])
    patches = jnp.stack(cols, axis=3)
    return patches.reshape(B, H * W, 9, C)


def split_heads(t, heads):
    B, N, HD = t.shape
    D = HD // heads
    return t.reshape(B, N, heads, D).transpose(0, 2, 1, 3).reshape(B * heads, N, D)


def split_heads_patches(t, heads):
    B, N, J, HD = t.shape
    D = HD // heads
    return t.reshape(B, N, J, heads, D).transpose(0, 3, 1, 2, 4).reshape(
        B * heads, N, J, D)


def merge_heads(t, heads):
    BH, N, D = t.shape
    B = BH // heads
    return t.reshape(B, heads, N, D).transpose(0, 2, 1, 3).reshape(B, N, heads * D)


def reference_forward(fmap_nchw, params, *, heads, dim_head):
    P = jax.lax.Precision.HIGHEST
    scale = dim_head ** (-0.5)
    B, C, H, W = fmap_nchw.shape
    N = H * W
    inner = heads * dim_head
    mm = lambda a, b: jnp.matmul(a, b, precision=P)

    x = jnp.transpose(fmap_nchw, (0, 2, 3, 1))
    xf = x.reshape(B, N, C)

    lin_q = mm(xf, params["w_lin_q"])
    patches = im2col3x3(x)
    dw = jnp.einsum("bnjc,jc->bnc", patches, params["w_dw"], precision=P)
    lin_kv = mm(dw, params["w_lin_kv_pw"])
    lin_k, lin_v = lin_kv[..., :inner], lin_kv[..., inner:]
    lq = split_heads(lin_q, heads)
    lk = split_heads(lin_k, heads)
    lv = split_heads(lin_v, heads)
    lq = jax.nn.softmax(lq, axis=-1) * scale
    lk = jax.nn.softmax(lk, axis=-2)
    context = jnp.einsum("bnd,bne->bde", lk, lv, precision=P)
    lin_out = jnp.einsum("bnd,bde->bne", lq, context, precision=P)
    lin_out = merge_heads(lin_out, heads)

    q = mm(xf, params["w_q"])
    kv = mm(xf, params["w_kv"])
    k_map, v_map = kv[..., :inner], kv[..., inner:]
    kp = split_heads_patches(im2col3x3(k_map.reshape(B, H, W, inner)), heads)
    vp = split_heads_patches(im2col3x3(v_map.reshape(B, H, W, inner)), heads)
    qh = split_heads(q, heads) * scale
    sim = jnp.einsum("bid,bijd->bij", qh, kp, precision=P)
    sim = sim - jnp.max(sim, axis=-1, keepdims=True)
    attn = jax.nn.softmax(sim, axis=-1)
    full_out = jnp.einsum("bij,bijd->bid", attn, vp, precision=P)
    full_out = merge_heads(full_out, heads)

    lin_out = jax.nn.gelu(lin_out, approximate=False)
    cat = jnp.concatenate([lin_out, full_out], axis=-1)
    out = mm(cat, params["w_out"]) + params["b_out"][None, None, :]
    Cout = params["w_out"].shape[1]
    return jnp.transpose(out.reshape(B, H, W, Cout), (0, 3, 1, 2))


# --------------------------------------------------------------------------
if __name__ == "__main__":
    B, dim, H, W = 2, 8, 16, 16
    heads, dim_head = 2, 16
    inner = heads * dim_head

    key = jax.random.PRNGKey(0)
    keys = jax.random.split(key, 8)
    std = 0.2
    params = {
        # PyTorch Conv2d weights (Cout, Cin, 1, 1) stored here as (Cin, Cout).
        "w_lin_q": jax.random.normal(keys[0], (dim, inner), jnp.float32) * std,
        "w_dw": jax.random.normal(keys[1], (9, dim), jnp.float32) * std,
        "w_lin_kv_pw": jax.random.normal(keys[2], (dim, 2 * inner), jnp.float32) * std,
        "w_q": jax.random.normal(keys[3], (dim, inner), jnp.float32) * std,
        "w_kv": jax.random.normal(keys[4], (dim, 2 * inner), jnp.float32) * std,
        "w_out": jax.random.normal(keys[5], (2 * inner, dim), jnp.float32) * std,
        "b_out": jax.random.normal(keys[6], (dim,), jnp.float32) * std,
    }
    fmap = jax.random.normal(keys[7], (B, dim, H, W), jnp.float32)   # NCHW

    # Small tiles on purpose: exercises the multi-tile online-softmax reduction
    # and the halo row-tiling code paths at the demo shapes.
    out = linear_attention_forward(fmap, params, heads=heads, dim_head=dim_head,
                                   seq_tile=128, row_tile=128)
    out = jax.block_until_ready(out)

    ref = reference_forward(fmap, params, heads=heads, dim_head=dim_head)
    assert out.shape == (B, dim, H, W)
    assert bool(jnp.all(jnp.isfinite(out)))
    # bf16 MXU operands / bf16 intermediates / tanh-GELU vs fp32 erf reference.
    assert bool(jnp.allclose(out, ref, atol=5e-2, rtol=5e-2))
    print("KERNEL_OK")
</pallas_src>

<mosaic_0001>
module attributes {stable_mosaic.version = 11 : i64} {
  func.func @_proj_kernel(%arg0: i32, %arg1: i32, %arg2: memref<1x128x8xbf16, #tpu.memory_space<vmem>>, %arg3: memref<8x32xbf16, #tpu.memory_space<vmem>>, %arg4: memref<8x32xbf16, #tpu.memory_space<vmem>>, %arg5: memref<8x32xbf16, #tpu.memory_space<vmem>>, %arg6: memref<8x32xbf16, #tpu.memory_space<vmem>>, %arg7: memref<1x128x32xbf16, #tpu.memory_space<vmem>>, %arg8: memref<1x128x32xbf16, #tpu.memory_space<vmem>>, %arg9: memref<1x128x32xbf16, #tpu.memory_space<vmem>>, %arg10: memref<1x128x32xbf16, #tpu.memory_space<vmem>>) attributes {dimension_semantics = [#tpu.dimension_semantics<parallel>, #tpu.dimension_semantics<parallel>], iteration_bounds = array<i64: 2, 2>, scalar_prefetch = 0 : i64, scratch_operands = 0 : i64, tpu.core_type = #tpu.core_type<tc>, window_params = [{transform_indices = @transform_0, window_bounds = array<i64: 1, 128, 8>}, {pipeline_mode = #tpu.pipeline_mode<synchronous>, transform_indices = @transform_1, window_bounds = array<i64: 8, 32>}, {pipeline_mode = #tpu.pipeline_mode<synchronous>, transform_indices = @transform_2, window_bounds = array<i64: 8, 32>}, {pipeline_mode = #tpu.pipeline_mode<synchronous>, transform_indices = @transform_3, window_bounds = array<i64: 8, 32>}, {pipeline_mode = #tpu.pipeline_mode<synchronous>, transform_indices = @transform_4, window_bounds = array<i64: 8, 32>}, {transform_indices = @transform_5, window_bounds = array<i64: 1, 128, 32>}, {transform_indices = @transform_6, window_bounds = array<i64: 1, 128, 32>}, {transform_indices = @transform_7, window_bounds = array<i64: 1, 128, 32>}, {transform_indices = @transform_8, window_bounds = array<i64: 1, 128, 32>}]} {
    %c0 = arith.constant 0 : index
    %c0_0 = arith.constant 0 : index
    %c0_1 = arith.constant 0 : index
    %0 = vector.load %arg2[%c0, %c0_0, %c0_1] : memref<1x128x8xbf16, #tpu.memory_space<vmem>>, vector<1x128x8xbf16>
    %1 = vector.shape_cast %0 : vector<1x128x8xbf16> to vector<128x8xbf16>
    %c0_2 = arith.constant 0 : index
    %c0_3 = arith.constant 0 : index
    %2 = vector.load %arg3[%c0_2, %c0_3] : memref<8x32xbf16, #tpu.memory_space<vmem>>, vector<8x32xbf16>
    %cst = arith.constant dense<0.000000e+00> : vector<128x32xf32>
    %3 = tpu.matmul %1, %2, %cst {dimension_numbers = #tpu.dot_dimension_numbers<[1], [0], [0], [1], [0, 0, 1, 1], [], []>} : vector<128x8xbf16>, vector<8x32xbf16>, vector<128x32xf32> -> vector<128x32xf32>
    %4 = arith.truncf %3 : vector<128x32xf32> to vector<128x32xbf16>
    %c0_4 = arith.constant 0 : index
    %c0_5 = arith.constant 0 : index
    %c0_6 = arith.constant 0 : index
    %5 = vector.load %arg7[%c0_4, %c0_5, %c0_6] : memref<1x128x32xbf16, #tpu.memory_space<vmem>>, vector<1x128x32xbf16>
    %6 = vector.shape_cast %5 : vector<1x128x32xbf16> to vector<128x32xbf16>
    %7 = vector.shape_cast %4 : vector<128x32xbf16> to vector<1x128x32xbf16>
    tpu.vector_store %arg7[%c0_4, %c0_5, %c0_6], %7 {strides = array<i32>} : memref<1x128x32xbf16, #tpu.memory_space<vmem>>, vector<1x128x32xbf16>,
    %c0_7 = arith.constant 0 : index
    %c0_8 = arith.constant 0 : index
    %8 = vector.load %arg4[%c0_7, %c0_8] : memref<8x32xbf16, #tpu.memory_space<vmem>>, vector<8x32xbf16>
    %cst_9 = arith.constant dense<0.000000e+00> : vector<128x32xf32>
    %9 = tpu.matmul %1, %8, %cst_9 {dimension_numbers = #tpu.dot_dimension_numbers<[1], [0], [0], [1], [0, 0, 1, 1], [], []>} : vector<128x8xbf16>, vector<8x32xbf16>, vector<128x32xf32> -> vector<128x32xf32>
    %10 = arith.truncf %9 : vector<128x32xf32> to vector<128x32xbf16>
    %c0_10 = arith.constant 0 : index
    %c0_11 = arith.constant 0 : index
    %c0_12 = arith.constant 0 : index
    %11 = vector.load %arg8[%c0_10, %c0_11, %c0_12] : memref<1x128x32xbf16, #tpu.memory_space<vmem>>, vector<1x128x32xbf16>
    %12 = vector.shape_cast %11 : vector<1x128x32xbf16> to vector<128x32xbf16>
    %13 = vector.shape_cast %10 : vector<128x32xbf16> to vector<1x128x32xbf16>
    tpu.vector_store %arg8[%c0_10, %c0_11, %c0_12], %13 {strides = array<i32>} : memref<1x128x32xbf16, #tpu.memory_space<vmem>>, vector<1x128x32xbf16>,
    %c0_13 = arith.constant 0 : index
    %c0_14 = arith.constant 0 : index
    %14 = vector.load %arg5[%c0_13, %c0_14] : memref<8x32xbf16, #tpu.memory_space<vmem>>, vector<8x32xbf16>
    %cst_15 = arith.constant dense<0.000000e+00> : vector<128x32xf32>
    %15 = tpu.matmul %1, %14, %cst_15 {dimension_numbers = #tpu.dot_dimension_numbers<[1], [0], [0], [1], [0, 0, 1, 1], [], []>} : vector<128x8xbf16>, vector<8x32xbf16>, vector<128x32xf32> -> vector<128x32xf32>
    %16 = arith.truncf %15 : vector<128x32xf32> to vector<128x32xbf16>
    %c0_16 = arith.constant 0 : index
    %c0_17 = arith.constant 0 : index
    %c0_18 = arith.constant 0 : index
    %17 = vector.load %arg9[%c0_16, %c0_17, %c0_18] : memref<1x128x32xbf16, #tpu.memory_space<vmem>>, vector<1x128x32xbf16>
    %18 = vector.shape_cast %17 : vector<1x128x32xbf16> to vector<128x32xbf16>
    %19 = vector.shape_cast %16 : vector<128x32xbf16> to vector<1x128x32xbf16>
    tpu.vector_store %arg9[%c0_16, %c0_17, %c0_18], %19 {strides = array<i32>} : memref<1x128x32xbf16, #tpu.memory_space<vmem>>, vector<1x128x32xbf16>,
    %c0_19 = arith.constant 0 : index
    %c0_20 = arith.constant 0 : index
    %20 = vector.load %arg6[%c0_19, %c0_20] : memref<8x32xbf16, #tpu.memory_space<vmem>>, vector<8x32xbf16>
    %cst_21 = arith.constant dense<0.000000e+00> : vector<128x32xf32>
    %21 = tpu.matmul %1, %20, %cst_21 {dimension_numbers = #tpu.dot_dimension_numbers<[1], [0], [0], [1], [0, 0, 1, 1], [], []>} : vector<128x8xbf16>, vector<8x32xbf16>, vector<128x32xf32> -> vector<128x32xf32>
    %22 = arith.truncf %21 : vector<128x32xf32> to vector<128x32xbf16>
    %c0_22 = arith.constant 0 : index
    %c0_23 = arith.constant 0 : index
    %c0_24 = arith.constant 0 : index
    %23 = vector.load %arg10[%c0_22, %c0_23, %c0_24] : memref<1x128x32xbf16, #tpu.memory_space<vmem>>, vector<1x128x32xbf16>
    %24 = vector.shape_cast %23 : vector<1x128x32xbf16> to vector<128x32xbf16>
    %25 = vector.shape_cast %22 : vector<128x32xbf16> to vector<1x128x32xbf16>
    tpu.vector_store %arg10[%c0_22, %c0_23, %c0_24], %25 {strides = array<i32>} : memref<1x128x32xbf16, #tpu.memory_space<vmem>>, vector<1x128x32xbf16>,
    return
  }
  func.func @transform_0(%arg0: i32, %arg1: i32) -> (i32, i32, i32) {
    %c0_i32 = arith.constant 0 : i32
    %c0_i32_0 = arith.constant 0 : i32
    return %arg0, %arg1, %c0_i32 : i32, i32, i32
  }
  func.func @transform_1(%arg0: i32, %arg1: i32) -> (i32, i32) {
    %c0_i32 = arith.constant 0 : i32
    %c0_i32_0 = arith.constant 0 : i32
    %c0_i32_1 = arith.constant 0 : i32
    return %c0_i32, %c0_i32_0 : i32, i32
  }
  func.func @transform_2(%arg0: i32, %arg1: i32) -> (i32, i32) {
    %c0_i32 = arith.constant 0 : i32
    %c0_i32_0 = arith.constant 0 : i32
    %c0_i32_1 = arith.constant 0 : i32
    return %c0_i32, %c0_i32_0 : i32, i32
  }
  func.func @transform_3(%arg0: i32, %arg1: i32) -> (i32, i32) {
    %c0_i32 = arith.constant 0 : i32
    %c0_i32_0 = arith.constant 0 : i32
    %c0_i32_1 = arith.constant 0 : i32
    return %c0_i32, %c0_i32_0 : i32, i32
  }
  func.func @transform_4(%arg0: i32, %arg1: i32) -> (i32, i32) {
    %c0_i32 = arith.constant 0 : i32
    %c0_i32_0 = arith.constant 0 : i32
    %c0_i32_1 = arith.constant 0 : i32
    return %c0_i32, %c0_i32_0 : i32, i32
  }
  func.func @transform_5(%arg0: i32, %arg1: i32) -> (i32, i32, i32) {
    %c0_i32 = arith.constant 0 : i32
    %c0_i32_0 = arith.constant 0 : i32
    return %arg0, %arg1, %c0_i32 : i32, i32, i32
  }
  func.func @transform_6(%arg0: i32, %arg1: i32) -> (i32, i32, i32) {
    %c0_i32 = arith.constant 0 : i32
    %c0_i32_0 = arith.constant 0 : i32
    return %arg0, %arg1, %c0_i32 : i32, i32, i32
  }
  func.func @transform_7(%arg0: i32, %arg1: i32) -> (i32, i32, i32) {
    %c0_i32 = arith.constant 0 : i32
    %c0_i32_0 = arith.constant 0 : i32
    return %arg0, %arg1, %c0_i32 : i32, i32, i32
  }
  func.func @transform_8(%arg0: i32, %arg1: i32) -> (i32, i32, i32) {
    %c0_i32 = arith.constant 0 : i32
    %c0_i32_0 = arith.constant 0 : i32
    return %arg0, %arg1, %c0_i32 : i32, i32, i32
  }
}

</mosaic_0001>

<bundles_post_ra>
// kernel: tpu_custom_call.1
= control target key start
LH: loop header
LB: loop body
LE: loop exit
PB: predicated region body
PF: predicated region fallthrough
CT: control target
= control target key end

     0   :  { %s1898_s27 = smov 0   ;;  %s1900_s28 = smov 0   ;;  %s2156_s0 = inlined_call_operand.vmem [shape: bf16[2,256,8], index: 0, kind: input, shape index: {}]   ;;  %s2157_s1 = inlined_call_operand.vmem [shape: bf16[8,32], index: 1, kind: input, shape index: {}]   ;;  %s2158_s2 = inlined_call_operand.vmem [shape: bf16[8,32], index: 2, kind: input, shape index: {}]   ;;  %s2159_s3 = inlined_call_operand.vmem [shape: bf16[8,32], index: 3, kind: input, shape index: {}]   ;;  %s2160_s4 = inlined_call_operand.vmem [shape: bf16[8,32], index: 4, kind: input, shape index: {}]   ;;  %s2161_s5 = inlined_call_operand.vmem [shape: bf16[2,256,32], index: 5, kind: output, shape index: {0}]   ;;  %s2162_s6 = inlined_call_operand.vmem [shape: bf16[2,256,32], index: 6, kind: output, shape index: {1}]   ;;  %s2163_s7 = inlined_call_operand.vmem [shape: bf16[2,256,32], index: 7, kind: output, shape index: {2}]   ;;  %s2164_s8 = inlined_call_operand.vmem [shape: bf16[2,256,32], index: 8, kind: output, shape index: {3}]  }
   0x1   :  { %s1902_s29 = smov 0   ;;  %s1904_s30 = smov 0  }
   0x2   :  { %s1906_s9 = smov 0  }
   0x3 LB: > { %s28_s10 = sadd.s32 1, %s1843_s29  ;;  %s31_s11 = sadd.s32 1, %s1847_s30  ;;  %s1851_s9 = sphi %s1906_s9, %s19_s9   ;;  %s1847_s30 = sphi %s1904_s30, %s2168_s30   ;;  %s1843_s29 = sphi %s1902_s29, %s2167_s29   ;;  %s1839_s28 = sphi %s1900_s28, %s2166_s28   ;;  %s1835_s27 = sphi %s1898_s27, %s2165_s27  }
   0x4   : > { %p29_p0 = scmp.ge.s32.totalorder %s28_s10, 2  ;;  %p1467_p1 = scmp.ge.s32.totalorder %s1851_s9, 1 }
   0x5   : > { %p296_p2 = scmp.lt.s32.totalorder %s1851_s9, 5 }
   0x6   : > { %s2170_s10 = smov (%p29_p0, %s28_s10), 0  ;;  %s2172_s11 = smov (!%p29_p0, %s31_s11), %s1847_s30 }
   0x7   : > { %p297_p3 = pnand %p1467_p1, %p296_p2  ;;  %p33_p4 = scmp.ge.s32.totalorder %s2172_s11, 2 }
   0x8   : > { %s1468_s16 = sshll.u32 (!%p297_p3), %s1835_s27, 4  ;;  %p366_p5 = scmp.lt.s32.totalorder (!%p297_p3), %s1839_s28, 1 }
   0x9   : > { %s2174_s11 = smov (%p33_p4, %s2172_s11), 0  ;;  %300 = sbr.rel (%p297_p3) target bundleno = 279 (0x117), region = 40 }
   0xa   : > { %p368_p6 = scmp.lt.s32.totalorder (!%p297_p3), %s1468_s16, 31 }
   0xe   : > { %v432_v0 = vld [vmem:[%s2157_s1] sm:$0xf]  ;;  %vm498_vm0 = vcmask 1043456   ;;  %s2176_s28 = smov (!%p366_p5, %s1839_s28), 1  ;;  %s2178_s16 = smov (!%p368_p6, %s1468_s16), 31  ;;  %vm473_vm1 = vcmask 64512  }
   0xf   : > { %v680_v1 = vld [vmem:[%s2158_s2] sm:$0xf]  ;;  %1761 = vmatprep.subr.msk.bf16.mxu0 %vm498_vm0, %v432_v0  ;;  %v500_v2 = vsel %vm498_vm0, %v432_v0, 0  ;;  %s1469_s21 = sshll.u32 %s2176_s28, 5  ;;  %vm663_vm2 = vcmask 257024  }
  0x10   : > { %1762 = vmatprep.subr.msk.bf16.mxu1 %vm498_vm0, %v680_v1  ;;  %v682_v3 = vsel %vm498_vm0, %v680_v1, 0  ;;  %1690 = vmatpush3.bf16.msra.mxu0 %v500_v2  ;;  %v861_v4 = vld [vmem:[%s2159_s3] sm:$0xf]  ;;  %s371_s22 = sadd.s32 %s1469_s21, %s2178_s16 }
  0x11   : > { %1708 = vmatpush3.bf16.msra.mxu1 %v682_v3  ;;  %v1042_v5 = vld [vmem:[%s2160_s4] sm:$0xf]  ;;  %1763 = vmatprep.subr.msk.bf16.mxu0 %vm498_vm0, %v861_v4  ;;  %s1949_s23 = sshll.u32 %s371_s22, 2  ;;  %v863_v7 = vsel %vm498_vm0, %v861_v4, 0 }
  0x12   : > { %1764 = vmatprep.subr.msk.bf16.mxu1 %vm498_vm0, %v1042_v5  ;;  %s373_s26 = scalar_lea.vmem %s2156_s0, %s1949_s23  ;;  %v1044_v9 = vsel %vm498_vm0, %v1042_v5, 0  ;;  %s1993_s12 = scalar_lea.vmem %s2161_s5, %s1949_s23 }
  0x13   : > { %v1805_v6 = vld [vmem:[%s373_s26] sm:$0xff]   ;;  %v1806_v8 = vld [vmem:[%s373_s26 + $0x8] sm:$0xff]   ;;  %v1807_v10 = vld [vmem:[%s373_s26 + $0x10] sm:$0xff]   ;;  %s1999_s15 = scalar_lea.vmem %s2162_s6, %s1949_s23  ;;  %s2065_s18 = scalar_lea.vmem %s2163_s7, %s1949_s23 }
  0x14   : > { %1691 = vmatprep.mubr.msk.bf16.mxu0 %vm473_vm1, %v1805_v6  ;;  %1709 = vmatprep.mubr.msk.bf16.mxu1 %vm473_vm1, %v1805_v6  ;;  %v1808_v11 = vld [vmem:[%s373_s26 + $0x18] sm:$0xff]   ;;  %v1809_v12 = vld [vmem:[%s373_s26 + $0x20] sm:$0xff]   ;;  %v1810_v13 = vld [vmem:[%s373_s26 + $0x28] sm:$0xff]   ;;  %s2071_s21 = scalar_lea.vmem %s2164_s8, %s1949_s23 }
  0x15   : > { %1692 = vmatmul.mubr.msk.bf16.vlgmr.msra.gmra.mxu0 %vm473_vm1, %v1806_v8  ;;  %1710 = vmatmul.mubr.msk.bf16.vlgmr.msra.gmra.mxu1 %vm473_vm1, %v1806_v8  ;;  %v1811_v14 = vld [vmem:[%s373_s26 + $0x30] sm:$0xff]   ;;  %v1812_v15 = vld [vmem:[%s373_s26 + $0x38] sm:$0xff]  }
  0x16   : > { %1726 = vmatpush3.bf16.msra.mxu0 %v863_v7  ;;  %1744 = vmatpush3.bf16.msra.mxu1 %v1044_v9 }
  0x17   : > { %1695 = vmatprep.mubr.msk.bf16.mxu0 %vm473_vm1, %v1807_v10  ;;  %1713 = vmatprep.mubr.msk.bf16.mxu1 %vm473_vm1, %v1807_v10 }
  0x1d   : > { %1696 = vmatmul.mubr.msk.bf16.gmra.mxu0 %vm473_vm1, %v1808_v11  ;;  %1714 = vmatmul.mubr.msk.bf16.gmra.mxu1 %vm473_vm1, %v1808_v11 }
  0x1e   : > { %1699 = vmatprep.mubr.msk.bf16.mxu0 %vm473_vm1, %v1809_v12  ;;  %1717 = vmatprep.mubr.msk.bf16.mxu1 %vm473_vm1, %v1809_v12 }
  0x25   : > { %1700 = vmatmul.mubr.msk.bf16.gmra.mxu0 %vm473_vm1, %v1810_v13  ;;  %1718 = vmatmul.mubr.msk.bf16.gmra.mxu1 %vm473_vm1, %v1810_v13 }
  0x26   : > { %1703 = vmatprep.mubr.msk.bf16.mxu0 %vm473_vm1, %v1811_v14  ;;  %1721 = vmatprep.mubr.msk.bf16.mxu1 %vm473_vm1, %v1811_v14 }
  0x2d   : > { %1704 = vmatmul.mubr.msk.bf16.gmra.mxu0 %vm473_vm1, %v1812_v15  ;;  %1722 = vmatmul.mubr.msk.bf16.gmra.mxu1 %vm473_vm1, %v1812_v15 }
  0x2e   : > { %1727 = vmatprep.mubr.msk.bf16.mxu0 %vm473_vm1, %v1805_v6  ;;  %1745 = vmatprep.mubr.msk.bf16.mxu1 %vm473_vm1, %v1805_v6 }
  0x35   : > { %1728 = vmatmul.mubr.msk.bf16.vlgmr.msra.gmra.mxu0 %vm473_vm1, %v1806_v8  ;;  %1746 = vmatmul.mubr.msk.bf16.vlgmr.msra.gmra.mxu1 %vm473_vm1, %v1806_v8 }
  0x36   : > { %1731 = vmatprep.mubr.msk.bf16.mxu0 %vm473_vm1, %v1807_v10  ;;  %1749 = vmatprep.mubr.msk.bf16.mxu1 %vm473_vm1, %v1807_v10 }
  0x3d   : > { %1732 = vmatmul.mubr.msk.bf16.gmra.mxu0 %vm473_vm1, %v1808_v11  ;;  %1750 = vmatmul.mubr.msk.bf16.gmra.mxu1 %vm473_vm1, %v1808_v11 }
  0x3e   : > { %1735 = vmatprep.mubr.msk.bf16.mxu0 %vm473_vm1, %v1809_v12  ;;  %1753 = vmatprep.mubr.msk.bf16.mxu1 %vm473_vm1, %v1809_v12 }
  0x45   : > { %1736 = vmatmul.mubr.msk.bf16.gmra.mxu0 %vm473_vm1, %v1810_v13  ;;  %1754 = vmatmul.mubr.msk.bf16.gmra.mxu1 %vm473_vm1, %v1810_v13 }
  0x46   : > { %1739 = vmatprep.mubr.msk.bf16.mxu0 %vm473_vm1, %v1811_v14  ;;  %1757 = vmatprep.mubr.msk.bf16.mxu1 %vm473_vm1, %v1811_v14 }
  0x4d   : > { %1740 = vmatmul.mubr.msk.bf16.gmra.mxu0 %vm473_vm1, %v1812_v15  ;;  %1758 = vmatmul.mubr.msk.bf16.gmra.mxu1 %vm473_vm1, %v1812_v15 }
  0xd5   : > { %v1693_v16 = vpop.f32.mrf.mxu0  ;;  %v1711_v17 = vpop.f32.mrf.mxu1 }
  0xd6   : > { %v1591_v18 = vpack.c.bf16 %v1693_v16, %v1693_v16  ;;  %v1607_v19 = vpack.c.bf16 %v1711_v17, %v1711_v17 }
  0xd7   : > { %v536_v20 = vpop.f32.mrf.mxu0  ;;  %v718_v21 = vpop.f32.mrf.mxu1 }
  0xd8   : > { %666 = vst.msk [vmem:[%s1993_s12 + $0x8] sm:$0xf] %vm663_vm2, %v1591_v18  ;;  %847 = vst.msk [vmem:[%s1999_s15 + $0x8] sm:$0xf] %vm663_vm2, %v1607_v19  ;;  %v1589_v22 = vpack.c.bf16 %v536_v20, %v536_v20  ;;  %v1605_v23 = vpack.c.bf16 %v718_v21, %v718_v21 }
  0xd9   : > { %v1694_v24 = vpop.f32.mrf.mxu0  ;;  %v1712_v25 = vpop.f32.mrf.mxu1 }
  0xda   : > { %664 = vst.msk [vmem:[%s1993_s12] sm:$0xf] %vm663_vm2, %v1589_v22  ;;  %845 = vst.msk [vmem:[%s1999_s15] sm:$0xf] %vm663_vm2, %v1605_v23  ;;  %v1592_v26 = vpack.c.bf16 %v1694_v24, %v1694_v24  ;;  %v1608_v27 = vpack.c.bf16 %v1712_v25, %v1712_v25 }
  0xdb   : > { %v539_v28 = vpop.f32.mrf.mxu0  ;;  %v721_v29 = vpop.f32.mrf.mxu1 }
  0xdc   : > { %667 = vst.msk [vmem:[%s1993_s12 + $0xc] sm:$0xf] %vm663_vm2, %v1592_v26  ;;  %848 = vst.msk [vmem:[%s1999_s15 + $0xc] sm:$0xf] %vm663_vm2, %v1608_v27  ;;  %v1590_v30 = vpack.c.bf16 %v539_v28, %v539_v28  ;;  %v1606_v31 = vpack.c.bf16 %v721_v29, %v721_v29 }
  0xdd   : > { %v1697_v32 = vpop.f32.mrf.mxu0  ;;  %v1715_v33 = vpop.f32.mrf.mxu1 }
  0xde   : > { %665 = vst.msk [vmem:[%s1993_s12 + $0x4] sm:$0xf] %vm663_vm2, %v1590_v30  ;;  %846 = vst.msk [vmem:[%s1999_s15 + $0x4] sm:$0xf] %vm663_vm2, %v1606_v31  ;;  %v1595_v34 = vpack.c.bf16 %v1697_v32, %v1697_v32  ;;  %v1611_v35 = vpack.c.bf16 %v1715_v33, %v1715_v33 }
  0xdf   : > { %v552_v36 = vpop.f32.mrf.mxu0  ;;  %v734_v37 = vpop.f32.mrf.mxu1 }
  0xe0   : > { %670 = vst.msk [vmem:[%s1993_s12 + $0x18] sm:$0xf] %vm663_vm2, %v1595_v34  ;;  %851 = vst.msk [vmem:[%s1999_s15 + $0x18] sm:$0xf] %vm663_vm2, %v1611_v35  ;;  %v1593_v38 = vpack.c.bf16 %v552_v36, %v552_v36  ;;  %v1609_v39 = vpack.c.bf16 %v734_v37, %v734_v37 }
  0xe1   : > { %v1698_v40 = vpop.f32.mrf.mxu0  ;;  %v1716_v41 = vpop.f32.mrf.mxu1 }
  0xe2   : > { %668 = vst.msk [vmem:[%s1993_s12 + $0x10] sm:$0xf] %vm663_vm2, %v1593_v38  ;;  %849 = vst.msk [vmem:[%s1999_s15 + $0x10] sm:$0xf] %vm663_vm2, %v1609_v39  ;;  %v1596_v42 = vpack.c.bf16 %v1698_v40, %v1698_v40  ;;  %v1612_v43 = vpack.c.bf16 %v1716_v41, %v1716_v41 }
  0xe3   : > { %v555_v44 = vpop.f32.mrf.mxu0  ;;  %v737_v45 = vpop.f32.mrf.mxu1 }
  0xe4   : > { %671 = vst.msk [vmem:[%s1993_s12 + $0x1c] sm:$0xf] %vm663_vm2, %v1596_v42  ;;  %852 = vst.msk [vmem:[%s1999_s15 + $0x1c] sm:$0xf] %vm663_vm2, %v1612_v43  ;;  %v1594_v46 = vpack.c.bf16 %v555_v44, %v555_v44  ;;  %v1610_v47 = vpack.c.bf16 %v737_v45, %v737_v45 }
  0xe5   : > { %v1701_v48 = vpop.f32.mrf.mxu0  ;;  %v1719_v49 = vpop.f32.mrf.mxu1 }
  0xe6   : > { %669 = vst.msk [vmem:[%s1993_s12 + $0x14] sm:$0xf] %vm663_vm2, %v1594_v46  ;;  %850 = vst.msk [vmem:[%s1999_s15 + $0x14] sm:$0xf] %vm663_vm2, %v1610_v47  ;;  %v1599_v50 = vpack.c.bf16 %v1701_v48, %v1701_v48  ;;  %v1615_v51 = vpack.c.bf16 %v1719_v49, %v1719_v49 }
  0xe7   : > { %v568_v52 = vpop.f32.mrf.mxu0  ;;  %v750_v53 = vpop.f32.mrf.mxu1 }
  0xe8   : > { %674 = vst.msk [vmem:[%s1993_s12 + $0x28] sm:$0xf] %vm663_vm2, %v1599_v50  ;;  %855 = vst.msk [vmem:[%s1999_s15 + $0x28] sm:$0xf] %vm663_vm2, %v1615_v51  ;;  %v1597_v54 = vpack.c.bf16 %v568_v52, %v568_v52  ;;  %v1613_v55 = vpack.c.bf16 %v750_v53, %v750_v53 }
  0xe9   : > { %v1702_v56 = vpop.f32.mrf.mxu0  ;;  %v1720_v57 = vpop.f32.mrf.mxu1 }
  0xea   : > { %672 = vst.msk [vmem:[%s1993_s12 + $0x20] sm:$0xf] %vm663_vm2, %v1597_v54  ;;  %853 = vst.msk [vmem:[%s1999_s15 + $0x20] sm:$0xf] %vm663_vm2, %v1613_v55  ;;  %v1600_v58 = vpack.c.bf16 %v1702_v56, %v1702_v56  ;;  %v1616_v59 = vpack.c.bf16 %v1720_v57, %v1720_v57 }
  0xeb   : > { %v571_v60 = vpop.f32.mrf.mxu0  ;;  %v753_v61 = vpop.f32.mrf.mxu1 }
  0xec   : > { %675 = vst.msk [vmem:[%s1993_s12 + $0x2c] sm:$0xf] %vm663_vm2, %v1600_v58  ;;  %856 = vst.msk [vmem:[%s1999_s15 + $0x2c] sm:$0xf] %vm663_vm2, %v1616_v59  ;;  %v1598_v62 = vpack.c.bf16 %v571_v60, %v571_v60  ;;  %v1614_v63 = vpack.c.bf16 %v753_v61, %v753_v61 }
  0xed   : > { %v1705_v0 = vpop.f32.mrf.mxu0  ;;  %v1723_v1 = vpop.f32.mrf.mxu1 }
  0xee   : > { %673 = vst.msk [vmem:[%s1993_s12 + $0x24] sm:$0xf] %vm663_vm2, %v1598_v62  ;;  %854 = vst.msk [vmem:[%s1999_s15 + $0x24] sm:$0xf] %vm663_vm2, %v1614_v63  ;;  %v1603_v2 = vpack.c.bf16 %v1705_v0, %v1705_v0  ;;  %v1619_v3 = vpack.c.bf16 %v1723_v1, %v1723_v1 }
  0xef   : > { %v584_v4 = vpop.f32.mrf.mxu0  ;;  %v766_v5 = vpop.f32.mrf.mxu1 }
  0xf0   : > { %678 = vst.msk [vmem:[%s1993_s12 + $0x38] sm:$0xf] %vm663_vm2, %v1603_v2  ;;  %859 = vst.msk [vmem:[%s1999_s15 + $0x38] sm:$0xf] %vm663_vm2, %v1619_v3  ;;  %v1601_v6 = vpack.c.bf16 %v584_v4, %v584_v4  ;;  %v1617_v7 = vpack.c.bf16 %v766_v5, %v766_v5 }
  0xf1   : > { %v1706_v8 = vpop.f32.mrf.mxu0  ;;  %v1724_v9 = vpop.f32.mrf.mxu1 }
  0xf2   : > { %676 = vst.msk [vmem:[%s1993_s12 + $0x30] sm:$0xf] %vm663_vm2, %v1601_v6  ;;  %857 = vst.msk [vmem:[%s1999_s15 + $0x30] sm:$0xf] %vm663_vm2, %v1617_v7  ;;  %v1604_v10 = vpack.c.bf16 %v1706_v8, %v1706_v8  ;;  %v1620_v11 = vpack.c.bf16 %v1724_v9, %v1724_v9 }
  0xf3   : > { %v587_v12 = vpop.f32.mrf.mxu0  ;;  %v769_v13 = vpop.f32.mrf.mxu1 }
  0xf4   : > { %679 = vst.msk [vmem:[%s1993_s12 + $0x3c] sm:$0xf] %vm663_vm2, %v1604_v10  ;;  %860 = vst.msk [vmem:[%s1999_s15 + $0x3c] sm:$0xf] %vm663_vm2, %v1620_v11  ;;  %v1602_v14 = vpack.c.bf16 %v587_v12, %v587_v12  ;;  %v1618_v15 = vpack.c.bf16 %v769_v13, %v769_v13 }
  0xf5   : > { %v1729_v16 = vpop.f32.mrf.mxu0  ;;  %v1747_v17 = vpop.f32.mrf.mxu1 }
  0xf6   : > { %677 = vst.msk [vmem:[%s1993_s12 + $0x34] sm:$0xf] %vm663_vm2, %v1602_v14  ;;  %858 = vst.msk [vmem:[%s1999_s15 + $0x34] sm:$0xf] %vm663_vm2, %v1618_v15  ;;  %v1623_v18 = vpack.c.bf16 %v1729_v16, %v1729_v16  ;;  %v1639_v19 = vpack.c.bf16 %v1747_v17, %v1747_v17 }
  0xf7   : > { %v899_v20 = vpop.f32.mrf.mxu0  ;;  %v1080_v21 = vpop.f32.mrf.mxu1 }
  0xf8   : > { %1028 = vst.msk [vmem:[%s2065_s18 + $0x8] sm:$0xf] %vm663_vm2, %v1623_v18  ;;  %1209 = vst.msk [vmem:[%s2071_s21 + $0x8] sm:$0xf] %vm663_vm2, %v1639_v19  ;;  %v1621_v22 = vpack.c.bf16 %v899_v20, %v899_v20  ;;  %v1637_v23 = vpack.c.bf16 %v1080_v21, %v1080_v21 }
  0xf9   : > { %v1730_v24 = vpop.f32.mrf.mxu0  ;;  %v1748_v25 = vpop.f32.mrf.mxu1 }
  0xfa   : > { %1026 = vst.msk [vmem:[%s2065_s18] sm:$0xf] %vm663_vm2, %v1621_v22  ;;  %1207 = vst.msk [vmem:[%s2071_s21] sm:$0xf] %vm663_vm2, %v1637_v23  ;;  %v1624_v26 = vpack.c.bf16 %v1730_v24, %v1730_v24  ;;  %v1640_v27 = vpack.c.bf16 %v1748_v25, %v1748_v25 }
  0xfb   : > { %v902_v28 = vpop.f32.mrf.mxu0  ;;  %v1083_v29 = vpop.f32.mrf.mxu1 }
  0xfc   : > { %1029 = vst.msk [vmem:[%s2065_s18 + $0xc] sm:$0xf] %vm663_vm2, %v1624_v26  ;;  %1210 = vst.msk [vmem:[%s2071_s21 + $0xc] sm:$0xf] %vm663_vm2, %v1640_v27  ;;  %v1622_v30 = vpack.c.bf16 %v902_v28, %v902_v28  ;;  %v1638_v31 = vpack.c.bf16 %v1083_v29, %v1083_v29 }
  0xfd   : > { %v1733_v32 = vpop.f32.mrf.mxu0  ;;  %v1751_v33 = vpop.f32.mrf.mxu1 }
  0xfe   : > { %1027 = vst.msk [vmem:[%s2065_s18 + $0x4] sm:$0xf] %vm663_vm2, %v1622_v30  ;;  %1208 = vst.msk [vmem:[%s2071_s21 + $0x4] sm:$0xf] %vm663_vm2, %v1638_v31  ;;  %v1627_v34 = vpack.c.bf16 %v1733_v32, %v1733_v32  ;;  %v1643_v35 = vpack.c.bf16 %v1751_v33, %v1751_v33 }
  0xff   : > { %v915_v36 = vpop.f32.mrf.mxu0  ;;  %v1096_v37 = vpop.f32.mrf.mxu1 }
 0x100   : > { %1032 = vst.msk [vmem:[%s2065_s18 + $0x18] sm:$0xf] %vm663_vm2, %v1627_v34  ;;  %1213 = vst.msk [vmem:[%s2071_s21 + $0x18] sm:$0xf] %vm663_vm2, %v1643_v35  ;;  %v1625_v38 = vpack.c.bf16 %v915_v36, %v915_v36  ;;  %v1641_v39 = vpack.c.bf16 %v1096_v37, %v1096_v37 }
 0x101   : > { %v1734_v40 = vpop.f32.mrf.mxu0  ;;  %v1752_v41 = vpop.f32.mrf.mxu1 }
 0x102   : > { %1030 = vst.msk [vmem:[%s2065_s18 + $0x10] sm:$0xf] %vm663_vm2, %v1625_v38  ;;  %1211 = vst.msk [vmem:[%s2071_s21 + $0x10] sm:$0xf] %vm663_vm2, %v1641_v39  ;;  %v1628_v42 = vpack.c.bf16 %v1734_v40, %v1734_v40  ;;  %v1644_v43 = vpack.c.bf16 %v1752_v41, %v1752_v41 }
 0x103   : > { %v918_v44 = vpop.f32.mrf.mxu0  ;;  %v1099_v45 = vpop.f32.mrf.mxu1 }
 0x104   : > { %1033 = vst.msk [vmem:[%s2065_s18 + $0x1c] sm:$0xf] %vm663_vm2, %v1628_v42  ;;  %1214 = vst.msk [vmem:[%s2071_s21 + $0x1c] sm:$0xf] %vm663_vm2, %v1644_v43  ;;  %v1626_v46 = vpack.c.bf16 %v918_v44, %v918_v44  ;;  %v1642_v47 = vpack.c.bf16 %v1099_v45, %v1099_v45 }
 0x105   : > { %v1737_v48 = vpop.f32.mrf.mxu0  ;;  %v1755_v49 = vpop.f32.mrf.mxu1 }
 0x106   : > { %1031 = vst.msk [vmem:[%s2065_s18 + $0x14] sm:$0xf] %vm663_vm2, %v1626_v46  ;;  %1212 = vst.msk [vmem:[%s2071_s21 + $0x14] sm:$0xf] %vm663_vm2, %v1642_v47  ;;  %v1631_v50 = vpack.c.bf16 %v1737_v48, %v1737_v48  ;;  %v1647_v51 = vpack.c.bf16 %v1755_v49, %v1755_v49 }
 0x107   : > { %v931_v52 = vpop.f32.mrf.mxu0  ;;  %v1112_v53 = vpop.f32.mrf.mxu1 }
 0x108   : > { %1036 = vst.msk [vmem:[%s2065_s18 + $0x28] sm:$0xf] %vm663_vm2, %v1631_v50  ;;  %1217 = vst.msk [vmem:[%s2071_s21 + $0x28] sm:$0xf] %vm663_vm2, %v1647_v51  ;;  %v1629_v54 = vpack.c.bf16 %v931_v52, %v931_v52  ;;  %v1645_v55 = vpack.c.bf16 %v1112_v53, %v1112_v53 }
 0x109   : > { %v1738_v56 = vpop.f32.mrf.mxu0  ;;  %v1756_v57 = vpop.f32.mrf.mxu1 }
 0x10a   : > { %1034 = vst.msk [vmem:[%s2065_s18 + $0x20] sm:$0xf] %vm663_vm2, %v1629_v54  ;;  %1215 = vst.msk [vmem:[%s2071_s21 + $0x20] sm:$0xf] %vm663_vm2, %v1645_v55  ;;  %v1632_v58 = vpack.c.bf16 %v1738_v56, %v1738_v56  ;;  %v1648_v59 = vpack.c.bf16 %v1756_v57, %v1756_v57 }
 0x10b   : > { %v934_v60 = vpop.f32.mrf.mxu0  ;;  %v1115_v61 = vpop.f32.mrf.mxu1 }
 0x10c   : > { %1037 = vst.msk [vmem:[%s2065_s18 + $0x2c] sm:$0xf] %vm663_vm2, %v1632_v58  ;;  %1218 = vst.msk [vmem:[%s2071_s21 + $0x2c] sm:$0xf] %vm663_vm2, %v1648_v59  ;;  %v1630_v62 = vpack.c.bf16 %v934_v60, %v934_v60  ;;  %v1646_v63 = vpack.c.bf16 %v1115_v61, %v1115_v61 }
 0x10d   : > { %v1741_v0 = vpop.f32.mrf.mxu0  ;;  %v1759_v1 = vpop.f32.mrf.mxu1 }
 0x10e   : > { %1035 = vst.msk [vmem:[%s2065_s18 + $0x24] sm:$0xf] %vm663_vm2, %v1630_v62  ;;  %1216 = vst.msk [vmem:[%s2071_s21 + $0x24] sm:$0xf] %vm663_vm2, %v1646_v63  ;;  %v1635_v2 = vpack.c.bf16 %v1741_v0, %v1741_v0  ;;  %v1651_v3 = vpack.c.bf16 %v1759_v1, %v1759_v1 }
 0x10f   : > { %v947_v4 = vpop.f32.mrf.mxu0  ;;  %v1128_v5 = vpop.f32.mrf.mxu1 }
 0x110   : > { %1040 = vst.msk [vmem:[%s2065_s18 + $0x38] sm:$0xf] %vm663_vm2, %v1635_v2  ;;  %1221 = vst.msk [vmem:[%s2071_s21 + $0x38] sm:$0xf] %vm663_vm2, %v1651_v3  ;;  %v1633_v6 = vpack.c.bf16 %v947_v4, %v947_v4  ;;  %v1649_v7 = vpack.c.bf16 %v1128_v5, %v1128_v5 }
 0x111   : > { %v1742_v8 = vpop.f32.mrf.mxu0  ;;  %v1760_v9 = vpop.f32.mrf.mxu1 }
 0x112   : > { %1038 = vst.msk [vmem:[%s2065_s18 + $0x30] sm:$0xf] %vm663_vm2, %v1633_v6  ;;  %1219 = vst.msk [vmem:[%s2071_s21 + $0x30] sm:$0xf] %vm663_vm2, %v1649_v7  ;;  %v1636_v10 = vpack.c.bf16 %v1742_v8, %v1742_v8  ;;  %v1652_v11 = vpack.c.bf16 %v1760_v9, %v1760_v9 }
 0x113   : > { %v950_v12 = vpop.f32.mrf.mxu0  ;;  %v1131_v13 = vpop.f32.mrf.mxu1 }
 0x114   : > { %1041 = vst.msk [vmem:[%s2065_s18 + $0x3c] sm:$0xf] %vm663_vm2, %v1636_v10  ;;  %1222 = vst.msk [vmem:[%s2071_s21 + $0x3c] sm:$0xf] %vm663_vm2, %v1652_v11  ;;  %v1634_v14 = vpack.c.bf16 %v950_v12, %v950_v12  ;;  %v1650_v15 = vpack.c.bf16 %v1131_v13, %v1131_v13 }
 0x116   : > { %1039 = vst.msk [vmem:[%s2065_s18 + $0x34] sm:$0xf] %vm663_vm2, %v1634_v14  ;;  %1220 = vst.msk [vmem:[%s2071_s21 + $0x34] sm:$0xf] %vm663_vm2, %v1650_v15 }
 0x117 PF: > { %s19_s9 = sadd.s32 1, %s1851_s9   ;;  %s2165_s27 = smov %s1843_s29 }
 0x118   : > { %p16_p7 = scmp.ge.s32.totalorder %s19_s9, 6   ;;  %s2166_s28 = smov %s1847_s30 }
 0x119   : > { %s2167_s29 = smov %s2170_s10  ;;  %s2168_s30 = smov %s2174_s11 }
 0x11a   :  { %18 = sbr.rel (!%p16_p7) target bundleno = 3 (0x3), region = 106 }

</bundles_post_ra>
